<compile_context>
chip_gen: v5e
topology: v5e:2x2
jax: 0.10.0
libtpu: 0.0.40
codegen_flags: <defaults>
</compile_context>

<pallas_src>
import functools
import math

import jax
import jax.numpy as jnp
from jax import lax
from jax.experimental import pallas as pl
from jax.experimental.pallas import tpu as pltpu


DEFAULT_MASK_VALUE = -0.7 * float(jnp.finfo(jnp.float32).max)
# A row whose running max never rose above this never saw a valid key
# (only possible when every KV tile of that batch element was masked/skipped).
_FULLY_MASKED_THRESH = 0.5 * DEFAULT_MASK_VALUE


def _pick_tile(dim, target, multiple):
    """Largest tile <= target that divides `dim` and is a multiple of
    `multiple`; falls back to the full dim (always legal for a BlockSpec)."""
    if dim <= target:
        return dim
    cand = (min(target, dim) // multiple) * multiple
    while cand >= multiple:
        if dim % cand == 0:
            return cand
        cand -= multiple
    return dim


def _init_scratch(q_ref, q_bf, m_sc, l_sc, acc_sc, softmax_temp):
    # Fold the softmax temperature into the one-time bf16 cast of Q. The Q
    # tile is constant across the S grid axis, so this is fully hoisted.
    q_bf[...] = (q_ref[0] * softmax_temp).astype(q_bf.dtype)
    m_sc[...] = jnp.full_like(m_sc, -jnp.inf)
    l_sc[...] = jnp.zeros_like(l_sc)
    acc_sc[...] = jnp.zeros_like(acc_sc)


def _head_update(h, d, q_bf, k_ref, v_ref, bias, m_sc, l_sc, acc_sc):
    """Online-softmax update of head `h` for the current (TL, TS) tile.

    NOTE: m / alpha / l / acc stay in f32. Correctness for masked tiles relies
    on alpha = exp(m_prev - m_new) underflowing to exactly 0.0 in f32 once a
    valid tile raises the running max above DEFAULT_MASK_VALUE.
    """
    lo = h * d
    hi = lo + d
    q_h = q_bf[:, lo:hi]                                  # [TL, D] bf16, pre-scaled
    k_h = k_ref[0, :, lo:hi].astype(jnp.bfloat16)         # [TS, D] bf16
    # QK^T contracting the last dims of both operands (no K transpose),
    # bf16 MXU operands, f32 accumulation.
    s = lax.dot_general(q_h, k_h, (((1,), (1,)), ((), ())),
                        preferred_element_type=jnp.float32)   # [TL, TS] f32
    if bias is not None:
        s = s + bias                                      # kv-only additive mask

    m_prev = m_sc[h]                                      # [TL, 1]
    m_new = jnp.maximum(m_prev, jnp.max(s, axis=-1, keepdims=True))
    alpha = jnp.exp(m_prev - m_new)                       # [TL, 1]
    p = jnp.exp(s - m_new)                                # [TL, TS] f32
    l_sc[h] = alpha * l_sc[h] + jnp.sum(p, axis=-1, keepdims=True)
    v_h = v_ref[0, :, lo:hi].astype(jnp.bfloat16)         # [TS, D]
    acc_sc[h] = alpha * acc_sc[h] + jnp.dot(
        p.astype(jnp.bfloat16), v_h, preferred_element_type=jnp.float32)
    m_sc[h] = m_new


def _finalize(o_ref, qv, m_sc, l_sc, acc_sc, num_heads):
    outs = []
    for h in range(num_heads):
        inv = pl.reciprocal(l_sc[h], approx=True)         # [TL, 1]
        o_h = acc_sc[h] * inv                             # [TL, D] f32
        if qv is not None:
            # Reference semantics: rows with q_mask == 0, or rows that never
            # saw a valid key, are softmax(all -inf) == NaN.
            nan_row = jnp.logical_or(qv <= 0.0, m_sc[h] <= _FULLY_MASKED_THRESH)
            o_h = jnp.where(nan_row, jnp.float32(jnp.nan), o_h)
        outs.append(o_h)
    # One lane-dense [TL, H*D] store (output block is (1, TL, H*D)).
    o_ref[0] = jnp.concatenate(outs, axis=-1).astype(o_ref.dtype)


def _flash_kernel_nomask(q_ref, k_ref, v_ref, o_ref,
                         q_bf, m_sc, l_sc, acc_sc, *,
                         num_heads, head_dim, softmax_temp):
    si = pl.program_id(2)

    @pl.when(si == 0)
    def _():
        _init_scratch(q_ref, q_bf, m_sc, l_sc, acc_sc, softmax_temp)

    for h in range(num_heads):
        _head_update(h, head_dim, q_bf, k_ref, v_ref, None, m_sc, l_sc, acc_sc)

    @pl.when(si == pl.num_programs(2) - 1)
    def _():
        _finalize(o_ref, None, m_sc, l_sc, acc_sc, num_heads)


def _flash_kernel_masked(tile_any_ref, q_ref, k_ref, v_ref, bias_ref, qv_ref,
                         o_ref, q_bf, m_sc, l_sc, acc_sc, *,
                         num_heads, head_dim, softmax_temp):
    n = pl.program_id(0)
    si = pl.program_id(2)

    @pl.when(si == 0)
    def _():
        _init_scratch(q_ref, q_bf, m_sc, l_sc, acc_sc, softmax_temp)

    # Skip KV tiles with no valid key (padding): the block DMA still happens,
    # but all QK^T / exp / accumulate work is elided.
    @pl.when(tile_any_ref[n, si] > 0)
    def _():
        bias = bias_ref[0]                                # [1, TS]: 0 / -huge
        for h in range(num_heads):
            _head_update(h, head_dim, q_bf, k_ref, v_ref, bias,
                         m_sc, l_sc, acc_sc)

    @pl.when(si == pl.num_programs(2) - 1)
    def _():
        _finalize(o_ref, qv_ref[0], m_sc, l_sc, acc_sc, num_heads)


def full_attention(queries, keys, values, q_mask=None, kv_mask=None,
                   *, block_q=256, block_k=1024):
    """Pallas equivalent of FullAttention.forward (use_dropout=False).

    queries: [N, L, H, D], keys/values: [N, S, H, D]
    q_mask: [N, L] (bool), kv_mask: [N, S] (bool)
    returns: [N, L, H, D]
    """
    N, L, H, D = queries.shape
    S = keys.shape[1]
    HD = H * D
    softmax_temp = 1.0 / math.sqrt(D)

    # TL is the sublane dim of Q/out blocks (multiple of 8); TS is the lane
    # dim of the kv-bias block (multiple of 128) and sublane dim of K/V blocks.
    TL = _pick_tile(L, block_q, 8)
    TS = _pick_tile(S, block_k, 128)
    # Megacore note: N * (L // TL) should stay >= 2 so the parallel axes can
    # split across both TensorCores on v7x.
    grid = (N, L // TL, S // TS)

    # Head-folded views: [N, L, H*D] / [N, S, H*D]. Pure reshapes, so no HBM
    # traffic, and the output block becomes a lane-dense (1, TL, H*D) slab.
    q_f = queries.reshape(N, L, HD)
    k_f = keys.reshape(N, S, HD)
    v_f = values.reshape(N, S, HD)

    scratch = [
        pltpu.VMEM((TL, HD), jnp.bfloat16),    # pre-scaled bf16 Q tile
        pltpu.VMEM((H, TL, 1), jnp.float32),   # running max, per head
        pltpu.VMEM((H, TL, 1), jnp.float32),   # running sum, per head
        pltpu.VMEM((H, TL, D), jnp.float32),   # un-normalized accumulator
    ]
    cparams = pltpu.CompilerParams(
        dimension_semantics=("parallel", "parallel", "arbitrary"),
        vmem_limit_bytes=48 * 1024 * 1024)
    out_shape = jax.ShapeDtypeStruct((N, L, HD), queries.dtype)

    if kv_mask is None:
        kernel = functools.partial(
            _flash_kernel_nomask,
            num_heads=H, head_dim=D, softmax_temp=softmax_temp)
        out_f = pl.pallas_call(
            kernel,
            out_shape=out_shape,
            grid_spec=pltpu.PrefetchScalarGridSpec(
                num_scalar_prefetch=0, grid=grid,
                in_specs=[
                    pl.BlockSpec((1, TL, HD), lambda n, li, si: (n, li, 0)),
                    pl.BlockSpec((1, TS, HD), lambda n, li, si: (n, si, 0)),
                    pl.BlockSpec((1, TS, HD), lambda n, li, si: (n, si, 0)),
                ],
                out_specs=pl.BlockSpec((1, TL, HD), lambda n, li, si: (n, li, 0)),
                scratch_shapes=scratch),
            compiler_params=cparams,
        )(q_f, k_f, v_f)
    else:
        kv_mask_b = kv_mask.astype(jnp.bool_)
        if q_mask is None:
            q_mask = jnp.ones((N, L), dtype=jnp.bool_)
        # q-mask only matters at finalize (NaN rows); kv-mask becomes a tiny
        # additive bias [N, 1, S] (0 for valid keys, huge negative for padded).
        qv = q_mask.astype(jnp.float32).reshape(N, L, 1)
        kv_bias = jnp.where(kv_mask_b, jnp.float32(0.0),
                            jnp.float32(DEFAULT_MASK_VALUE)).reshape(N, 1, S)
        # Per-(batch, kv-tile) "has any valid key" flags (scalar prefetch).
        tile_any = jnp.any(kv_mask_b.reshape(N, S // TS, TS),
                           axis=-1).astype(jnp.int32)

        kernel = functools.partial(
            _flash_kernel_masked,
            num_heads=H, head_dim=D, softmax_temp=softmax_temp)
        out_f = pl.pallas_call(
            kernel,
            out_shape=out_shape,
            grid_spec=pltpu.PrefetchScalarGridSpec(
                num_scalar_prefetch=1, grid=grid,
                in_specs=[
                    pl.BlockSpec((1, TL, HD), lambda n, li, si, fl: (n, li, 0)),
                    pl.BlockSpec((1, TS, HD), lambda n, li, si, fl: (n, si, 0)),
                    pl.BlockSpec((1, TS, HD), lambda n, li, si, fl: (n, si, 0)),
                    pl.BlockSpec((1, 1, TS), lambda n, li, si, fl: (n, 0, si)),
                    pl.BlockSpec((1, TL, 1), lambda n, li, si, fl: (n, li, 0)),
                ],
                out_specs=pl.BlockSpec((1, TL, HD),
                                       lambda n, li, si, fl: (n, li, 0)),
                scratch_shapes=scratch),
            compiler_params=cparams,
        )(tile_any, q_f, k_f, v_f, kv_bias, qv)

    return out_f.reshape(N, L, H, D)


def _reference_attention(queries, keys, values, q_mask=None, kv_mask=None):
    """Pure-JAX reference mirroring the PyTorch module."""
    QK = jnp.einsum('nlhd,nshd->nlsh', queries, keys)
    if kv_mask is not None:
        m = q_mask[:, :, None, None] & kv_mask[:, None, :, None]
        QK = jnp.where(m, QK, -jnp.inf)
    softmax_temp = 1.0 / math.sqrt(queries.shape[3])
    A = jax.nn.softmax(softmax_temp * QK, axis=2)
    return jnp.einsum('nlsh,nshd->nlhd', A, values)


if __name__ == "__main__":
    ATOL, RTOL = 3e-2, 5e-2   # bf16 MXU operands (f32 accumulation)

    # --- small test, matches the original module's shape convention ---------
    N, L, S, H, D = 2, 8, 8, 4, 32
    key = jax.random.PRNGKey(0)
    kq, kk, kv = jax.random.split(key, 3)
    queries = jax.random.normal(kq, (N, L, H, D), dtype=jnp.float32)
    keys = jax.random.normal(kk, (N, S, H, D), dtype=jnp.float32)
    values = jax.random.normal(kv, (N, S, H, D), dtype=jnp.float32)

    q_mask = jnp.arange(L)[None, :] < jnp.array([[L], [L - 2]])    # [N, L]
    kv_mask = jnp.arange(S)[None, :] < jnp.array([[S], [S - 3]])   # [N, S]

    # unmasked path (no mask inputs at all)
    out_nomask = full_attention(queries, keys, values)
    jax.block_until_ready(out_nomask)
    ref_nomask = _reference_attention(queries, keys, values)
    assert jnp.allclose(out_nomask, ref_nomask, atol=ATOL, rtol=RTOL)

    # masked path: compare valid query rows; fully-masked rows must be NaN
    out_masked = full_attention(queries, keys, values, q_mask, kv_mask)
    jax.block_until_ready(out_masked)
    ref_masked = _reference_attention(queries, keys, values, q_mask, kv_mask)
    valid = q_mask[:, :, None, None]
    assert jnp.allclose(jnp.where(valid, out_masked, 0.0),
                        jnp.where(valid, ref_masked, 0.0),
                        atol=ATOL, rtol=RTOL)
    expect_nan = jnp.broadcast_to(~q_mask[:, :, None, None], out_masked.shape)
    assert bool(jnp.all(jnp.isnan(out_masked) == expect_nan))

    # --- multi-tile test: online-softmax S loop, L tiling, tile skipping ----
    N2, L2, S2, H2, D2 = 2, 256, 256, 2, 32
    kq2, kk2, kv2 = jax.random.split(jax.random.PRNGKey(1), 3)
    q2 = jax.random.normal(kq2, (N2, L2, H2, D2), dtype=jnp.float32)
    k2 = jax.random.normal(kk2, (N2, S2, H2, D2), dtype=jnp.float32)
    v2 = jax.random.normal(kv2, (N2, S2, H2, D2), dtype=jnp.float32)
    qm2 = jnp.stack([jnp.arange(L2) < 200, jnp.arange(L2) >= 56])    # [N2, L2]
    km2 = jnp.stack([jnp.arange(S2) < 100, jnp.arange(S2) >= 156])   # [N2, S2]

    out2_nm = full_attention(q2, k2, v2, block_q=128, block_k=128)
    jax.block_until_ready(out2_nm)
    ref2_nm = _reference_attention(q2, k2, v2)
    assert jnp.allclose(out2_nm, ref2_nm, atol=ATOL, rtol=RTOL)

    out2 = full_attention(q2, k2, v2, qm2, km2, block_q=128, block_k=128)
    jax.block_until_ready(out2)
    ref2 = _reference_attention(q2, k2, v2, qm2, km2)
    valid2 = qm2[:, :, None, None]
    assert jnp.allclose(jnp.where(valid2, out2, 0.0),
                        jnp.where(valid2, ref2, 0.0),
                        atol=ATOL, rtol=RTOL)

    print("KERNEL_OK")
</pallas_src>

<mosaic_0001>
module attributes {stable_mosaic.version = 11 : i64} {
  func.func @_flash_kernel_nomask(%arg0: i32, %arg1: i32, %arg2: i32, %arg3: memref<1x8x128xf32, #tpu.memory_space<vmem>>, %arg4: memref<1x8x128xf32, #tpu.memory_space<vmem>>, %arg5: memref<1x8x128xf32, #tpu.memory_space<vmem>>, %arg6: memref<1x8x128xf32, #tpu.memory_space<vmem>>, %arg7: memref<8x128xbf16, #tpu.memory_space<vmem>>, %arg8: memref<4x8x1xf32, #tpu.memory_space<vmem>>, %arg9: memref<4x8x1xf32, #tpu.memory_space<vmem>>, %arg10: memref<4x8x32xf32, #tpu.memory_space<vmem>>) attributes {dimension_semantics = [#tpu.dimension_semantics<parallel>, #tpu.dimension_semantics<parallel>, #tpu.dimension_semantics<arbitrary>], iteration_bounds = array<i64: 2, 1, 1>, scalar_prefetch = 0 : i64, scratch_operands = 4 : i64, tpu.core_type = #tpu.core_type<tc>, window_params = [{transform_indices = @transform_0, window_bounds = array<i64: 1, 8, 128>}, {transform_indices = @transform_1, window_bounds = array<i64: 1, 8, 128>}, {transform_indices = @transform_2, window_bounds = array<i64: 1, 8, 128>}, {transform_indices = @transform_3, window_bounds = array<i64: 1, 8, 128>}]} {
    %c0_i32 = arith.constant 0 : i32
    %0 = arith.cmpi eq, %arg2, %c0_i32 : i32
    %1 = arith.extui %0 : i1 to i32
    %c0_i32_0 = arith.constant 0 : i32
    %2 = arith.cmpi ne, %1, %c0_i32_0 : i32
    scf.if %2 {
      %c0_115 = arith.constant 0 : index
      %c0_116 = arith.constant 0 : index
      %c0_117 = arith.constant 0 : index
      %166 = vector.load %arg3[%c0_115, %c0_116, %c0_117] : memref<1x8x128xf32, #tpu.memory_space<vmem>>, vector<1x8x128xf32>
      %167 = vector.shape_cast %166 : vector<1x8x128xf32> to vector<8x128xf32>
      %cst_118 = arith.constant 0.176776692 : f32
      %168 = vector.broadcast %cst_118 : f32 to vector<8x128xf32>
      %169 = arith.mulf %167, %168 : vector<8x128xf32>
      %170 = arith.truncf %169 : vector<8x128xf32> to vector<8x128xbf16>
      %c0_119 = arith.constant 0 : index
      %c0_120 = arith.constant 0 : index
      %171 = vector.load %arg7[%c0_119, %c0_120] : memref<8x128xbf16, #tpu.memory_space<vmem>>, vector<8x128xbf16>
      tpu.vector_store %arg7[%c0_119, %c0_120], %170 {strides = array<i32>} : memref<8x128xbf16, #tpu.memory_space<vmem>>, vector<8x128xbf16>,
      %cst_121 = arith.constant 0xFF800000 : f32
      %172 = vector.broadcast %cst_121 : f32 to vector<4x8x1xf32>
      %c0_122 = arith.constant 0 : index
      %c0_123 = arith.constant 0 : index
      %c0_124 = arith.constant 0 : index
      %173 = vector.load %arg8[%c0_122, %c0_123, %c0_124] : memref<4x8x1xf32, #tpu.memory_space<vmem>>, vector<4x8x1xf32>
      tpu.vector_store %arg8[%c0_122, %c0_123, %c0_124], %172 {strides = array<i32>} : memref<4x8x1xf32, #tpu.memory_space<vmem>>, vector<4x8x1xf32>,
      %cst_125 = arith.constant 0.000000e+00 : f32
      %174 = vector.broadcast %cst_125 : f32 to vector<4x8x1xf32>
      %c0_126 = arith.constant 0 : index
      %c0_127 = arith.constant 0 : index
      %c0_128 = arith.constant 0 : index
      %175 = vector.load %arg9[%c0_126, %c0_127, %c0_128] : memref<4x8x1xf32, #tpu.memory_space<vmem>>, vector<4x8x1xf32>
      tpu.vector_store %arg9[%c0_126, %c0_127, %c0_128], %174 {strides = array<i32>} : memref<4x8x1xf32, #tpu.memory_space<vmem>>, vector<4x8x1xf32>,
      %cst_129 = arith.constant 0.000000e+00 : f32
      %176 = vector.broadcast %cst_129 : f32 to vector<4x8x32xf32>
      %c0_130 = arith.constant 0 : index
      %c0_131 = arith.constant 0 : index
      %c0_132 = arith.constant 0 : index
      %177 = vector.load %arg10[%c0_130, %c0_131, %c0_132] : memref<4x8x32xf32, #tpu.memory_space<vmem>>, vector<4x8x32xf32>
      tpu.vector_store %arg10[%c0_130, %c0_131, %c0_132], %176 {strides = array<i32>} : memref<4x8x32xf32, #tpu.memory_space<vmem>>, vector<4x8x32xf32>,
    } else {
    }
    %c0 = arith.constant 0 : index
    %c0_1 = arith.constant 0 : index
    %3 = vector.load %arg7[%c0, %c0_1] : memref<8x128xbf16, #tpu.memory_space<vmem>>, vector<8x32xbf16>
    %c0_2 = arith.constant 0 : index
    %c0_3 = arith.constant 0 : index
    %c0_4 = arith.constant 0 : index
    %4 = vector.load %arg4[%c0_2, %c0_3, %c0_4] : memref<1x8x128xf32, #tpu.memory_space<vmem>>, vector<1x8x32xf32>
    %5 = vector.shape_cast %4 : vector<1x8x32xf32> to vector<8x32xf32>
    %6 = arith.truncf %5 : vector<8x32xf32> to vector<8x32xbf16>
    %cst = arith.constant dense<0.000000e+00> : vector<8x8xf32>
    %7 = tpu.matmul %3, %6, %cst {dimension_numbers = #tpu.dot_dimension_numbers<[1], [1], [0], [0], [0, 0, 1, 0], [], []>} : vector<8x32xbf16>, vector<8x32xbf16>, vector<8x8xf32> -> vector<8x8xf32>
    %c0_5 = arith.constant 0 : index
    %c0_6 = arith.constant 0 : index
    %c0_7 = arith.constant 0 : index
    %8 = vector.load %arg8[%c0_5, %c0_6, %c0_7] : memref<4x8x1xf32, #tpu.memory_space<vmem>>, vector<1x8x1xf32>
    %9 = vector.shape_cast %8 : vector<1x8x1xf32> to vector<8x1xf32>
    %cst_8 = arith.constant dense<0xFF800000> : vector<8xf32>
    %10 = vector.multi_reduction <maximumf>, %7, %cst_8 [1] : vector<8x8xf32> to vector<8xf32>
    %11 = vector.shape_cast %10 : vector<8xf32> to vector<8x1xf32>
    %12 = arith.maximumf %9, %11 : vector<8x1xf32>
    %13 = arith.subf %9, %12 : vector<8x1xf32>
    %14 = math.exp %13 : vector<8x1xf32>
    %15 = vector.broadcast %12 : vector<8x1xf32> to vector<8x8xf32>
    %16 = arith.subf %7, %15 : vector<8x8xf32>
    %17 = math.exp %16 : vector<8x8xf32>
    %c0_9 = arith.constant 0 : index
    %c0_10 = arith.constant 0 : index
    %c0_11 = arith.constant 0 : index
    %18 = vector.load %arg9[%c0_9, %c0_10, %c0_11] : memref<4x8x1xf32, #tpu.memory_space<vmem>>, vector<1x8x1xf32>
    %19 = vector.shape_cast %18 : vector<1x8x1xf32> to vector<8x1xf32>
    %20 = arith.mulf %14, %19 : vector<8x1xf32>
    %cst_12 = arith.constant dense<0.000000e+00> : vector<8xf32>
    %21 = vector.multi_reduction <add>, %17, %cst_12 [1] : vector<8x8xf32> to vector<8xf32>
    %22 = vector.shape_cast %21 : vector<8xf32> to vector<8x1xf32>
    %23 = arith.addf %20, %22 : vector<8x1xf32>
    %c0_13 = arith.constant 0 : index
    %c0_14 = arith.constant 0 : index
    %c0_15 = arith.constant 0 : index
    %24 = vector.load %arg9[%c0_13, %c0_14, %c0_15] : memref<4x8x1xf32, #tpu.memory_space<vmem>>, vector<1x8x1xf32>
    %25 = vector.shape_cast %24 : vector<1x8x1xf32> to vector<8x1xf32>
    %26 = vector.shape_cast %23 : vector<8x1xf32> to vector<1x8x1xf32>
    tpu.vector_store %arg9[%c0_13, %c0_14, %c0_15], %26 {strides = array<i32>} : memref<4x8x1xf32, #tpu.memory_space<vmem>>, vector<1x8x1xf32>,
    %c0_16 = arith.constant 0 : index
    %c0_17 = arith.constant 0 : index
    %c0_18 = arith.constant 0 : index
    %27 = vector.load %arg5[%c0_16, %c0_17, %c0_18] : memref<1x8x128xf32, #tpu.memory_space<vmem>>, vector<1x8x32xf32>
    %28 = vector.shape_cast %27 : vector<1x8x32xf32> to vector<8x32xf32>
    %29 = arith.truncf %28 : vector<8x32xf32> to vector<8x32xbf16>
    %c0_19 = arith.constant 0 : index
    %c0_20 = arith.constant 0 : index
    %c0_21 = arith.constant 0 : index
    %30 = vector.load %arg10[%c0_19, %c0_20, %c0_21] : memref<4x8x32xf32, #tpu.memory_space<vmem>>, vector<1x8x32xf32>
    %31 = vector.shape_cast %30 : vector<1x8x32xf32> to vector<8x32xf32>
    %32 = vector.broadcast %14 : vector<8x1xf32> to vector<8x32xf32>
    %33 = arith.mulf %32, %31 : vector<8x32xf32>
    %34 = arith.truncf %17 : vector<8x8xf32> to vector<8x8xbf16>
    %cst_22 = arith.constant dense<0.000000e+00> : vector<8x32xf32>
    %35 = tpu.matmul %34, %29, %cst_22 {dimension_numbers = #tpu.dot_dimension_numbers<[1], [0], [0], [1], [0, 0, 1, 1], [], []>} : vector<8x8xbf16>, vector<8x32xbf16>, vector<8x32xf32> -> vector<8x32xf32>
    %36 = arith.addf %33, %35 : vector<8x32xf32>
    %c0_23 = arith.constant 0 : index
    %c0_24 = arith.constant 0 : index
    %c0_25 = arith.constant 0 : index
    %37 = vector.load %arg10[%c0_23, %c0_24, %c0_25] : memref<4x8x32xf32, #tpu.memory_space<vmem>>, vector<1x8x32xf32>
    %38 = vector.shape_cast %37 : vector<1x8x32xf32> to vector<8x32xf32>
    %39 = vector.shape_cast %36 : vector<8x32xf32> to vector<1x8x32xf32>
    tpu.vector_store %arg10[%c0_23, %c0_24, %c0_25], %39 {strides = array<i32>} : memref<4x8x32xf32, #tpu.memory_space<vmem>>, vector<1x8x32xf32>,
    %c0_26 = arith.constant 0 : index
    %c0_27 = arith.constant 0 : index
    %c0_28 = arith.constant 0 : index
    %40 = vector.load %arg8[%c0_26, %c0_27, %c0_28] : memref<4x8x1xf32, #tpu.memory_space<vmem>>, vector<1x8x1xf32>
    %41 = vector.shape_cast %40 : vector<1x8x1xf32> to vector<8x1xf32>
    %42 = vector.shape_cast %12 : vector<8x1xf32> to vector<1x8x1xf32>
    tpu.vector_store %arg8[%c0_26, %c0_27, %c0_28], %42 {strides = array<i32>} : memref<4x8x1xf32, #tpu.memory_space<vmem>>, vector<1x8x1xf32>,
    %c0_29 = arith.constant 0 : index
    %c32 = arith.constant 32 : index
    %43 = vector.load %arg7[%c0_29, %c32] : memref<8x128xbf16, #tpu.memory_space<vmem>>, vector<8x32xbf16>
    %c0_30 = arith.constant 0 : index
    %c0_31 = arith.constant 0 : index
    %c32_32 = arith.constant 32 : index
    %44 = vector.load %arg4[%c0_30, %c0_31, %c32_32] : memref<1x8x128xf32, #tpu.memory_space<vmem>>, vector<1x8x32xf32>
    %45 = vector.shape_cast %44 : vector<1x8x32xf32> to vector<8x32xf32>
    %46 = arith.truncf %45 : vector<8x32xf32> to vector<8x32xbf16>
    %cst_33 = arith.constant dense<0.000000e+00> : vector<8x8xf32>
    %47 = tpu.matmul %43, %46, %cst_33 {dimension_numbers = #tpu.dot_dimension_numbers<[1], [1], [0], [0], [0, 0, 1, 0], [], []>} : vector<8x32xbf16>, vector<8x32xbf16>, vector<8x8xf32> -> vector<8x8xf32>
    %c1 = arith.constant 1 : index
    %c0_34 = arith.constant 0 : index
    %c0_35 = arith.constant 0 : index
    %48 = vector.load %arg8[%c1, %c0_34, %c0_35] : memref<4x8x1xf32, #tpu.memory_space<vmem>>, vector<1x8x1xf32>
    %49 = vector.shape_cast %48 : vector<1x8x1xf32> to vector<8x1xf32>
    %cst_36 = arith.constant dense<0xFF800000> : vector<8xf32>
    %50 = vector.multi_reduction <maximumf>, %47, %cst_36 [1] : vector<8x8xf32> to vector<8xf32>
    %51 = vector.shape_cast %50 : vector<8xf32> to vector<8x1xf32>
    %52 = arith.maximumf %49, %51 : vector<8x1xf32>
    %53 = arith.subf %49, %52 : vector<8x1xf32>
    %54 = math.exp %53 : vector<8x1xf32>
    %55 = vector.broadcast %52 : vector<8x1xf32> to vector<8x8xf32>
    %56 = arith.subf %47, %55 : vector<8x8xf32>
    %57 = math.exp %56 : vector<8x8xf32>
    %c1_37 = arith.constant 1 : index
    %c0_38 = arith.constant 0 : index
    %c0_39 = arith.constant 0 : index
    %58 = vector.load %arg9[%c1_37, %c0_38, %c0_39] : memref<4x8x1xf32, #tpu.memory_space<vmem>>, vector<1x8x1xf32>
    %59 = vector.shape_cast %58 : vector<1x8x1xf32> to vector<8x1xf32>
    %60 = arith.mulf %54, %59 : vector<8x1xf32>
    %cst_40 = arith.constant dense<0.000000e+00> : vector<8xf32>
    %61 = vector.multi_reduction <add>, %57, %cst_40 [1] : vector<8x8xf32> to vector<8xf32>
    %62 = vector.shape_cast %61 : vector<8xf32> to vector<8x1xf32>
    %63 = arith.addf %60, %62 : vector<8x1xf32>
    %c1_41 = arith.constant 1 : index
    %c0_42 = arith.constant 0 : index
    %c0_43 = arith.constant 0 : index
    %64 = vector.load %arg9[%c1_41, %c0_42, %c0_43] : memref<4x8x1xf32, #tpu.memory_space<vmem>>, vector<1x8x1xf32>
    %65 = vector.shape_cast %64 : vector<1x8x1xf32> to vector<8x1xf32>
    %66 = vector.shape_cast %63 : vector<8x1xf32> to vector<1x8x1xf32>
    tpu.vector_store %arg9[%c1_41, %c0_42, %c0_43], %66 {strides = array<i32>} : memref<4x8x1xf32, #tpu.memory_space<vmem>>, vector<1x8x1xf32>,
    %c0_44 = arith.constant 0 : index
    %c0_45 = arith.constant 0 : index
    %c32_46 = arith.constant 32 : index
    %67 = vector.load %arg5[%c0_44, %c0_45, %c32_46] : memref<1x8x128xf32, #tpu.memory_space<vmem>>, vector<1x8x32xf32>
    %68 = vector.shape_cast %67 : vector<1x8x32xf32> to vector<8x32xf32>
    %69 = arith.truncf %68 : vector<8x32xf32> to vector<8x32xbf16>
    %c1_47 = arith.constant 1 : index
    %c0_48 = arith.constant 0 : index
    %c0_49 = arith.constant 0 : index
    %70 = vector.load %arg10[%c1_47, %c0_48, %c0_49] : memref<4x8x32xf32, #tpu.memory_space<vmem>>, vector<1x8x32xf32>
    %71 = vector.shape_cast %70 : vector<1x8x32xf32> to vector<8x32xf32>
    %72 = vector.broadcast %54 : vector<8x1xf32> to vector<8x32xf32>
    %73 = arith.mulf %72, %71 : vector<8x32xf32>
    %74 = arith.truncf %57 : vector<8x8xf32> to vector<8x8xbf16>
    %cst_50 = arith.constant dense<0.000000e+00> : vector<8x32xf32>
    %75 = tpu.matmul %74, %69, %cst_50 {dimension_numbers = #tpu.dot_dimension_numbers<[1], [0], [0], [1], [0, 0, 1, 1], [], []>} : vector<8x8xbf16>, vector<8x32xbf16>, vector<8x32xf32> -> vector<8x32xf32>
    %76 = arith.addf %73, %75 : vector<8x32xf32>
    %c1_51 = arith.constant 1 : index
    %c0_52 = arith.constant 0 : index
    %c0_53 = arith.constant 0 : index
    %77 = vector.load %arg10[%c1_51, %c0_52, %c0_53] : memref<4x8x32xf32, #tpu.memory_space<vmem>>, vector<1x8x32xf32>
    %78 = vector.shape_cast %77 : vector<1x8x32xf32> to vector<8x32xf32>
    %79 = vector.shape_cast %76 : vector<8x32xf32> to vector<1x8x32xf32>
    tpu.vector_store %arg10[%c1_51, %c0_52, %c0_53], %79 {strides = array<i32>} : memref<4x8x32xf32, #tpu.memory_space<vmem>>, vector<1x8x32xf32>,
    %c1_54 = arith.constant 1 : index
    %c0_55 = arith.constant 0 : index
    %c0_56 = arith.constant 0 : index
    %80 = vector.load %arg8[%c1_54, %c0_55, %c0_56] : memref<4x8x1xf32, #tpu.memory_space<vmem>>, vector<1x8x1xf32>
    %81 = vector.shape_cast %80 : vector<1x8x1xf32> to vector<8x1xf32>
    %82 = vector.shape_cast %52 : vector<8x1xf32> to vector<1x8x1xf32>
    tpu.vector_store %arg8[%c1_54, %c0_55, %c0_56], %82 {strides = array<i32>} : memref<4x8x1xf32, #tpu.memory_space<vmem>>, vector<1x8x1xf32>,
    %c0_57 = arith.constant 0 : index
    %c64 = arith.constant 64 : index
    %83 = vector.load %arg7[%c0_57, %c64] : memref<8x128xbf16, #tpu.memory_space<vmem>>, vector<8x32xbf16>
    %c0_58 = arith.constant 0 : index
    %c0_59 = arith.constant 0 : index
    %c64_60 = arith.constant 64 : index
    %84 = vector.load %arg4[%c0_58, %c0_59, %c64_60] : memref<1x8x128xf32, #tpu.memory_space<vmem>>, vector<1x8x32xf32>
    %85 = vector.shape_cast %84 : vector<1x8x32xf32> to vector<8x32xf32>
    %86 = arith.truncf %85 : vector<8x32xf32> to vector<8x32xbf16>
    %cst_61 = arith.constant dense<0.000000e+00> : vector<8x8xf32>
    %87 = tpu.matmul %83, %86, %cst_61 {dimension_numbers = #tpu.dot_dimension_numbers<[1], [1], [0], [0], [0, 0, 1, 0], [], []>} : vector<8x32xbf16>, vector<8x32xbf16>, vector<8x8xf32> -> vector<8x8xf32>
    %c2 = arith.constant 2 : index
    %c0_62 = arith.constant 0 : index
    %c0_63 = arith.constant 0 : index
    %88 = vector.load %arg8[%c2, %c0_62, %c0_63] : memref<4x8x1xf32, #tpu.memory_space<vmem>>, vector<1x8x1xf32>
    %89 = vector.shape_cast %88 : vector<1x8x1xf32> to vector<8x1xf32>
    %cst_64 = arith.constant dense<0xFF800000> : vector<8xf32>
    %90 = vector.multi_reduction <maximumf>, %87, %cst_64 [1] : vector<8x8xf32> to vector<8xf32>
    %91 = vector.shape_cast %90 : vector<8xf32> to vector<8x1xf32>
    %92 = arith.maximumf %89, %91 : vector<8x1xf32>
    %93 = arith.subf %89, %92 : vector<8x1xf32>
    %94 = math.exp %93 : vector<8x1xf32>
    %95 = vector.broadcast %92 : vector<8x1xf32> to vector<8x8xf32>
    %96 = arith.subf %87, %95 : vector<8x8xf32>
    %97 = math.exp %96 : vector<8x8xf32>
    %c2_65 = arith.constant 2 : index
    %c0_66 = arith.constant 0 : index
    %c0_67 = arith.constant 0 : index
    %98 = vector.load %arg9[%c2_65, %c0_66, %c0_67] : memref<4x8x1xf32, #tpu.memory_space<vmem>>, vector<1x8x1xf32>
    %99 = vector.shape_cast %98 : vector<1x8x1xf32> to vector<8x1xf32>
    %100 = arith.mulf %94, %99 : vector<8x1xf32>
    %cst_68 = arith.constant dense<0.000000e+00> : vector<8xf32>
    %101 = vector.multi_reduction <add>, %97, %cst_68 [1] : vector<8x8xf32> to vector<8xf32>
    %102 = vector.shape_cast %101 : vector<8xf32> to vector<8x1xf32>
    %103 = arith.addf %100, %102 : vector<8x1xf32>
    %c2_69 = arith.constant 2 : index
    %c0_70 = arith.constant 0 : index
    %c0_71 = arith.constant 0 : index
    %104 = vector.load %arg9[%c2_69, %c0_70, %c0_71] : memref<4x8x1xf32, #tpu.memory_space<vmem>>, vector<1x8x1xf32>
    %105 = vector.shape_cast %104 : vector<1x8x1xf32> to vector<8x1xf32>
    %106 = vector.shape_cast %103 : vector<8x1xf32> to vector<1x8x1xf32>
    tpu.vector_store %arg9[%c2_69, %c0_70, %c0_71], %106 {strides = array<i32>} : memref<4x8x1xf32, #tpu.memory_space<vmem>>, vector<1x8x1xf32>,
    %c0_72 = arith.constant 0 : index
    %c0_73 = arith.constant 0 : index
    %c64_74 = arith.constant 64 : index
    %107 = vector.load %arg5[%c0_72, %c0_73, %c64_74] : memref<1x8x128xf32, #tpu.memory_space<vmem>>, vector<1x8x32xf32>
    %108 = vector.shape_cast %107 : vector<1x8x32xf32> to vector<8x32xf32>
    %109 = arith.truncf %108 : vector<8x32xf32> to vector<8x32xbf16>
    %c2_75 = arith.constant 2 : index
    %c0_76 = arith.constant 0 : index
    %c0_77 = arith.constant 0 : index
    %110 = vector.load %arg10[%c2_75, %c0_76, %c0_77] : memref<4x8x32xf32, #tpu.memory_space<vmem>>, vector<1x8x32xf32>
    %111 = vector.shape_cast %110 : vector<1x8x32xf32> to vector<8x32xf32>
    %112 = vector.broadcast %94 : vector<8x1xf32> to vector<8x32xf32>
    %113 = arith.mulf %112, %111 : vector<8x32xf32>
    %114 = arith.truncf %97 : vector<8x8xf32> to vector<8x8xbf16>
    %cst_78 = arith.constant dense<0.000000e+00> : vector<8x32xf32>
    %115 = tpu.matmul %114, %109, %cst_78 {dimension_numbers = #tpu.dot_dimension_numbers<[1], [0], [0], [1], [0, 0, 1, 1], [], []>} : vector<8x8xbf16>, vector<8x32xbf16>, vector<8x32xf32> -> vector<8x32xf32>
    %116 = arith.addf %113, %115 : vector<8x32xf32>
    %c2_79 = arith.constant 2 : index
    %c0_80 = arith.constant 0 : index
    %c0_81 = arith.constant 0 : index
    %117 = vector.load %arg10[%c2_79, %c0_80, %c0_81] : memref<4x8x32xf32, #tpu.memory_space<vmem>>, vector<1x8x32xf32>
    %118 = vector.shape_cast %117 : vector<1x8x32xf32> to vector<8x32xf32>
    %119 = vector.shape_cast %116 : vector<8x32xf32> to vector<1x8x32xf32>
    tpu.vector_store %arg10[%c2_79, %c0_80, %c0_81], %119 {strides = array<i32>} : memref<4x8x32xf32, #tpu.memory_space<vmem>>, vector<1x8x32xf32>,
    %c2_82 = arith.constant 2 : index
    %c0_83 = arith.constant 0 : index
    %c0_84 = arith.constant 0 : index
    %120 = vector.load %arg8[%c2_82, %c0_83, %c0_84] : memref<4x8x1xf32, #tpu.memory_space<vmem>>, vector<1x8x1xf32>
    %121 = vector.shape_cast %120 : vector<1x8x1xf32> to vector<8x1xf32>
    %122 = vector.shape_cast %92 : vector<8x1xf32> to vector<1x8x1xf32>
    tpu.vector_store %arg8[%c2_82, %c0_83, %c0_84], %122 {strides = array<i32>} : memref<4x8x1xf32, #tpu.memory_space<vmem>>, vector<1x8x1xf32>,
    %c0_85 = arith.constant 0 : index
    %c96 = arith.constant 96 : index
    %123 = vector.load %arg7[%c0_85, %c96] : memref<8x128xbf16, #tpu.memory_space<vmem>>, vector<8x32xbf16>
    %c0_86 = arith.constant 0 : index
    %c0_87 = arith.constant 0 : index
    %c96_88 = arith.constant 96 : index
    %124 = vector.load %arg4[%c0_86, %c0_87, %c96_88] : memref<1x8x128xf32, #tpu.memory_space<vmem>>, vector<1x8x32xf32>
    %125 = vector.shape_cast %124 : vector<1x8x32xf32> to vector<8x32xf32>
    %126 = arith.truncf %125 : vector<8x32xf32> to vector<8x32xbf16>
    %cst_89 = arith.constant dense<0.000000e+00> : vector<8x8xf32>
    %127 = tpu.matmul %123, %126, %cst_89 {dimension_numbers = #tpu.dot_dimension_numbers<[1], [1], [0], [0], [0, 0, 1, 0], [], []>} : vector<8x32xbf16>, vector<8x32xbf16>, vector<8x8xf32> -> vector<8x8xf32>
    %c3 = arith.constant 3 : index
    %c0_90 = arith.constant 0 : index
    %c0_91 = arith.constant 0 : index
    %128 = vector.load %arg8[%c3, %c0_90, %c0_91] : memref<4x8x1xf32, #tpu.memory_space<vmem>>, vector<1x8x1xf32>
    %129 = vector.shape_cast %128 : vector<1x8x1xf32> to vector<8x1xf32>
    %cst_92 = arith.constant dense<0xFF800000> : vector<8xf32>
    %130 = vector.multi_reduction <maximumf>, %127, %cst_92 [1] : vector<8x8xf32> to vector<8xf32>
    %131 = vector.shape_cast %130 : vector<8xf32> to vector<8x1xf32>
    %132 = arith.maximumf %129, %131 : vector<8x1xf32>
    %133 = arith.subf %129, %132 : vector<8x1xf32>
    %134 = math.exp %133 : vector<8x1xf32>
    %135 = vector.broadcast %132 : vector<8x1xf32> to vector<8x8xf32>
    %136 = arith.subf %127, %135 : vector<8x8xf32>
    %137 = math.exp %136 : vector<8x8xf32>
    %c3_93 = arith.constant 3 : index
    %c0_94 = arith.constant 0 : index
    %c0_95 = arith.constant 0 : index
    %138 = vector.load %arg9[%c3_93, %c0_94, %c0_95] : memref<4x8x1xf32, #tpu.memory_space<vmem>>, vector<1x8x1xf32>
    %139 = vector.shape_cast %138 : vector<1x8x1xf32> to vector<8x1xf32>
    %140 = arith.mulf %134, %139 : vector<8x1xf32>
    %cst_96 = arith.constant dense<0.000000e+00> : vector<8xf32>
    %141 = vector.multi_reduction <add>, %137, %cst_96 [1] : vector<8x8xf32> to vector<8xf32>
    %142 = vector.shape_cast %141 : vector<8xf32> to vector<8x1xf32>
    %143 = arith.addf %140, %142 : vector<8x1xf32>
    %c3_97 = arith.constant 3 : index
    %c0_98 = arith.constant 0 : index
    %c0_99 = arith.constant 0 : index
    %144 = vector.load %arg9[%c3_97, %c0_98, %c0_99] : memref<4x8x1xf32, #tpu.memory_space<vmem>>, vector<1x8x1xf32>
    %145 = vector.shape_cast %144 : vector<1x8x1xf32> to vector<8x1xf32>
    %146 = vector.shape_cast %143 : vector<8x1xf32> to vector<1x8x1xf32>
    tpu.vector_store %arg9[%c3_97, %c0_98, %c0_99], %146 {strides = array<i32>} : memref<4x8x1xf32, #tpu.memory_space<vmem>>, vector<1x8x1xf32>,
    %c0_100 = arith.constant 0 : index
    %c0_101 = arith.constant 0 : index
    %c96_102 = arith.constant 96 : index
    %147 = vector.load %arg5[%c0_100, %c0_101, %c96_102] : memref<1x8x128xf32, #tpu.memory_space<vmem>>, vector<1x8x32xf32>
    %148 = vector.shape_cast %147 : vector<1x8x32xf32> to vector<8x32xf32>
    %149 = arith.truncf %148 : vector<8x32xf32> to vector<8x32xbf16>
    %c3_103 = arith.constant 3 : index
    %c0_104 = arith.constant 0 : index
    %c0_105 = arith.constant 0 : index
    %150 = vector.load %arg10[%c3_103, %c0_104, %c0_105] : memref<4x8x32xf32, #tpu.memory_space<vmem>>, vector<1x8x32xf32>
    %151 = vector.shape_cast %150 : vector<1x8x32xf32> to vector<8x32xf32>
    %152 = vector.broadcast %134 : vector<8x1xf32> to vector<8x32xf32>
    %153 = arith.mulf %152, %151 : vector<8x32xf32>
    %154 = arith.truncf %137 : vector<8x8xf32> to vector<8x8xbf16>
    %cst_106 = arith.constant dense<0.000000e+00> : vector<8x32xf32>
    %155 = tpu.matmul %154, %149, %cst_106 {dimension_numbers = #tpu.dot_dimension_numbers<[1], [0], [0], [1], [0, 0, 1, 1], [], []>} : vector<8x8xbf16>, vector<8x32xbf16>, vector<8x32xf32> -> vector<8x32xf32>
    %156 = arith.addf %153, %155 : vector<8x32xf32>
    %c3_107 = arith.constant 3 : index
    %c0_108 = arith.constant 0 : index
    %c0_109 = arith.constant 0 : index
    %157 = vector.load %arg10[%c3_107, %c0_108, %c0_109] : memref<4x8x32xf32, #tpu.memory_space<vmem>>, vector<1x8x32xf32>
    %158 = vector.shape_cast %157 : vector<1x8x32xf32> to vector<8x32xf32>
    %159 = vector.shape_cast %156 : vector<8x32xf32> to vector<1x8x32xf32>
    tpu.vector_store %arg10[%c3_107, %c0_108, %c0_109], %159 {strides = array<i32>} : memref<4x8x32xf32, #tpu.memory_space<vmem>>, vector<1x8x32xf32>,
    %c3_110 = arith.constant 3 : index
    %c0_111 = arith.constant 0 : index
    %c0_112 = arith.constant 0 : index
    %160 = vector.load %arg8[%c3_110, %c0_111, %c0_112] : memref<4x8x1xf32, #tpu.memory_space<vmem>>, vector<1x8x1xf32>
    %161 = vector.shape_cast %160 : vector<1x8x1xf32> to vector<8x1xf32>
    %162 = vector.shape_cast %132 : vector<8x1xf32> to vector<1x8x1xf32>
    tpu.vector_store %arg8[%c3_110, %c0_111, %c0_112], %162 {strides = array<i32>} : memref<4x8x1xf32, #tpu.memory_space<vmem>>, vector<1x8x1xf32>,
    %c0_i32_113 = arith.constant 0 : i32
    %163 = arith.cmpi eq, %arg2, %c0_i32_113 : i32
    %164 = arith.extui %163 : i1 to i32
    %c0_i32_114 = arith.constant 0 : i32
    %165 = arith.cmpi ne, %164, %c0_i32_114 : i32
    scf.if %165 {
      %c0_115 = arith.constant 0 : index
      %c0_116 = arith.constant 0 : index
      %c0_117 = arith.constant 0 : index
      %166 = vector.load %arg9[%c0_115, %c0_116, %c0_117] : memref<4x8x1xf32, #tpu.memory_space<vmem>>, vector<1x8x1xf32>
      %167 = vector.shape_cast %166 : vector<1x8x1xf32> to vector<8x1xf32>
      %168 = tpu.reciprocal %167 {approx = true} : vector<8x1xf32> -> vector<8x1xf32>
      %c0_118 = arith.constant 0 : index
      %c0_119 = arith.constant 0 : index
      %c0_120 = arith.constant 0 : index
      %169 = vector.load %arg10[%c0_118, %c0_119, %c0_120] : memref<4x8x32xf32, #tpu.memory_space<vmem>>, vector<1x8x32xf32>
      %170 = vector.shape_cast %169 : vector<1x8x32xf32> to vector<8x32xf32>
      %171 = vector.broadcast %168 : vector<8x1xf32> to vector<8x32xf32>
      %172 = arith.mulf %170, %171 : vector<8x32xf32>
      %c1_121 = arith.constant 1 : index
      %c0_122 = arith.constant 0 : index
      %c0_123 = arith.constant 0 : index
      %173 = vector.load %arg9[%c1_121, %c0_122, %c0_123] : memref<4x8x1xf32, #tpu.memory_space<vmem>>, vector<1x8x1xf32>
      %174 = vector.shape_cast %173 : vector<1x8x1xf32> to vector<8x1xf32>
      %175 = tpu.reciprocal %174 {approx = true} : vector<8x1xf32> -> vector<8x1xf32>
      %c1_124 = arith.constant 1 : index
      %c0_125 = arith.constant 0 : index
      %c0_126 = arith.constant 0 : index
      %176 = vector.load %arg10[%c1_124, %c0_125, %c0_126] : memref<4x8x32xf32, #tpu.memory_space<vmem>>, vector<1x8x32xf32>
      %177 = vector.shape_cast %176 : vector<1x8x32xf32> to vector<8x32xf32>
      %178 = vector.broadcast %175 : vector<8x1xf32> to vector<8x32xf32>
      %179 = arith.mulf %177, %178 : vector<8x32xf32>
      %c2_127 = arith.constant 2 : index
      %c0_128 = arith.constant 0 : index
      %c0_129 = arith.constant 0 : index
      %180 = vector.load %arg9[%c2_127, %c0_128, %c0_129] : memref<4x8x1xf32, #tpu.memory_space<vmem>>, vector<1x8x1xf32>
      %181 = vector.shape_cast %180 : vector<1x8x1xf32> to vector<8x1xf32>
      %182 = tpu.reciprocal %181 {approx = true} : vector<8x1xf32> -> vector<8x1xf32>
      %c2_130 = arith.constant 2 : index
      %c0_131 = arith.constant 0 : index
      %c0_132 = arith.constant 0 : index
      %183 = vector.load %arg10[%c2_130, %c0_131, %c0_132] : memref<4x8x32xf32, #tpu.memory_space<vmem>>, vector<1x8x32xf32>
      %184 = vector.shape_cast %183 : vector<1x8x32xf32> to vector<8x32xf32>
      %185 = vector.broadcast %182 : vector<8x1xf32> to vector<8x32xf32>
      %186 = arith.mulf %184, %185 : vector<8x32xf32>
      %c3_133 = arith.constant 3 : index
      %c0_134 = arith.constant 0 : index
      %c0_135 = arith.constant 0 : index
      %187 = vector.load %arg9[%c3_133, %c0_134, %c0_135] : memref<4x8x1xf32, #tpu.memory_space<vmem>>, vector<1x8x1xf32>
      %188 = vector.shape_cast %187 : vector<1x8x1xf32> to vector<8x1xf32>
      %189 = tpu.reciprocal %188 {approx = true} : vector<8x1xf32> -> vector<8x1xf32>
      %c3_136 = arith.constant 3 : index
      %c0_137 = arith.constant 0 : index
      %c0_138 = arith.constant 0 : index
      %190 = vector.load %arg10[%c3_136, %c0_137, %c0_138] : memref<4x8x32xf32, #tpu.memory_space<vmem>>, vector<1x8x32xf32>
      %191 = vector.shape_cast %190 : vector<1x8x32xf32> to vector<8x32xf32>
      %192 = vector.broadcast %189 : vector<8x1xf32> to vector<8x32xf32>
      %193 = arith.mulf %191, %192 : vector<8x32xf32>
      %194 = tpu.concatenate %172, %179, %186, %193 in 1 : vector<8x32xf32>, vector<8x32xf32>, vector<8x32xf32>, vector<8x32xf32> -> vector<8x128xf32>
      %c0_139 = arith.constant 0 : index
      %c0_140 = arith.constant 0 : index
      %c0_141 = arith.constant 0 : index
      %195 = vector.load %arg6[%c0_139, %c0_140, %c0_141] : memref<1x8x128xf32, #tpu.memory_space<vmem>>, vector<1x8x128xf32>
      %196 = vector.shape_cast %195 : vector<1x8x128xf32> to vector<8x128xf32>
      %197 = vector.shape_cast %194 : vector<8x128xf32> to vector<1x8x128xf32>
      tpu.vector_store %arg6[%c0_139, %c0_140, %c0_141], %197 {strides = array<i32>} : memref<1x8x128xf32, #tpu.memory_space<vmem>>, vector<1x8x128xf32>,
    } else {
    }
    return
  }
  func.func @transform_0(%arg0: i32, %arg1: i32, %arg2: i32) -> (i32, i32, i32) {
    %c0_i32 = arith.constant 0 : i32
    %c0_i32_0 = arith.constant 0 : i32
    return %arg0, %arg1, %c0_i32 : i32, i32, i32
  }
  func.func @transform_1(%arg0: i32, %arg1: i32, %arg2: i32) -> (i32, i32, i32) {
    %c0_i32 = arith.constant 0 : i32
    %c0_i32_0 = arith.constant 0 : i32
    return %arg0, %arg2, %c0_i32 : i32, i32, i32
  }
  func.func @transform_2(%arg0: i32, %arg1: i32, %arg2: i32) -> (i32, i32, i32) {
    %c0_i32 = arith.constant 0 : i32
    %c0_i32_0 = arith.constant 0 : i32
    return %arg0, %arg2, %c0_i32 : i32, i32, i32
  }
  func.func @transform_3(%arg0: i32, %arg1: i32, %arg2: i32) -> (i32, i32, i32) {
    %c0_i32 = arith.constant 0 : i32
    %c0_i32_0 = arith.constant 0 : i32
    return %arg0, %arg1, %c0_i32 : i32, i32, i32
  }
}

</mosaic_0001>

<bundles_post_ra>
// kernel: tpu_custom_call.1
= control target key start
LH: loop header
LB: loop body
LE: loop exit
PB: predicated region body
PF: predicated region fallthrough
CT: control target
= control target key end

     0   :  { %s1446_s0 = inlined_call_operand.hbm [shape: f32[2,8,128], index: 0, kind: input, shape index: {}]   ;;  %s1447_s1 = inlined_call_operand.hbm [shape: f32[2,8,128], index: 1, kind: input, shape index: {}]   ;;  %s1448_s2 = inlined_call_operand.hbm [shape: f32[2,8,128], index: 2, kind: input, shape index: {}]   ;;  %s1449_s3 = inlined_call_operand.hbm [shape: f32[2,8,128], index: 3, kind: output, shape index: {}]  }
   0x1   :  { %1452 = sst [smem:[#allocation19_spill]] %s1447_s1 }
   0x2   :  { %8 = vsyncpa [#allocation7], 0 }
   0x3   :  { %10 = vsyncpa [#allocation7 + $0x1], 0 }
   0x4   :  { %11 = vsyncpa [#allocation10], 0 }
   0x5   :  { %13 = vsyncpa [#allocation10 + $0x1], 0 }
   0x6   :  { %14 = vsyncpa [#allocation8], 0 }
   0x7   :  { %16 = vsyncpa [#allocation8 + $0x1], 0  ;;  %s1208_s12 = smov 0   ;;  %s1210_s13 = smov 0  }
   0x8   :  { %s1212_s14 = smov 0   ;;  %s1214_s15 = smov 0  }
   0x9   :  { %s1216_s16 = smov 0   ;;  %s1218_s17 = smov 0  }
   0xa LB: > { %1453 = sst [smem:[#allocation16_spill]] %s1176_s16  ;;  %s1239_s18 = sadd.s32 4294967295, %s1180_s17   ;;  %s1180_s17 = sphi %s1218_s17, %s22_s17   ;;  %s1176_s16 = sphi %s1216_s16, %s1465_s16   ;;  %s1172_s15 = sphi %s1214_s15, %s1464_s15   ;;  %s1168_s14 = sphi %s1212_s14, %s1468_s14   ;;  %s1164_s13 = sphi %s1210_s13, %s1467_s13   ;;  %s1160_s12 = sphi %s1208_s12, %s1466_s12  }
   0xb   : > { %s873_s19 = sadd.s32 4294967294, %s1180_s17   ;;  %s41_s20 = sadd.s32 1, %s1176_s16 }
   0xc   : > { %s50_s21 = sadd.s32 1, %s1168_s14  ;;  %p43_p0 = scmp.ge.s32.totalorder %s41_s20, 2 }
   0xd   : > { %p57_p1 = scmp.ne.s32.totalorder %s1168_s14, %s1164_s13  ;;  %p58_p2 = scmp.eq.s32.totalorder %s1180_s17, 0 }
   0xe   : > { %p63_p3 = scmp.ne.s32.totalorder %s1164_s13, %s1160_s12  ;;  %s1470_s20 = smov (%p43_p0, %s41_s20), 0 }
   0xf   : > { %1454 = sst [smem:[#allocation17_spill]] %s1470_s20  ;;  %p1251_p4 = por %p58_p2, %p57_p1 }
  0x10   : > { %p64_p5 = scmp.eq.s32.totalorder %s1239_s18, 0  ;;  %s45_s23 = ssub.s32 %s1176_s16, %s1470_s20 }
  0x11   : > { %p145_p6 = scmp.eq.s32.totalorder %s1239_s18, 1  ;;  %p48_p7 = scmp.eq.s32.totalorder %s45_s23, 0 }
  0x12   : > { %p1259_p8 = por %p64_p5, %p63_p3  ;;  %p151_p10 = scmp.eq.s32.totalorder %s873_s19, 1 }
  0x13   : > { %p1263_p9 = por %p145_p6, %p57_p1  ;;  %p875_p12 = scmp.ge.s32.totalorder %s1180_s17, 2 }
  0x14   : > { %s1268_s26 = scalar_select %p48_p7, %s1168_s14, %s50_s21  }
  0x15   : > { %p1270_p11 = por %p151_p10, %p63_p3  ;;  %p921_p13 = scmp.lt.s32.totalorder %s1180_s17, 2 }
  0x16   : > { %1458 = sst [smem:[#allocation18_spill]] %s1268_s26  ;;  %s171_s28 = sand.u32 1, %s1168_s14  }
  0x17   : > { %s876_s29 = sshll.u32 %s171_s28, 3  ;;  %s877_s30 = sshll.u32 %s1176_s16, 3 }
  0x18   : > { %p1280_p0 = pnand %p921_p13, %p1251_p4  ;;  %s191_s5 = sand.u32 1, %s1180_s17  }
  0x19   : > { %s1461_s1 = sld [smem:[#allocation19_spill]]  ;;  %s195_s10 = scalar_lea.vmem [#allocation9], %s876_s29 }
  0x1a   : > { %s204_s11 = sshll.u32 %s195_s10, 4  ;;  %s192_s19 = scalar_lea.sflag [#allocation10], %s191_s5  ;;  %s205_s11 = int_to_ptr.vmem [resolvable:$true] %s204_s11 }
  0x1b   : > { %p882_p1 = scmp.ge.s32.totalorder %s1180_s17, 1  ;;  %p229_p2 = scmp.lt.s32.totalorder %s1180_s17, 3 }
  0x1c   : > { %s180_s6 = scalar_lea.hbm %s1446_s0, %s877_s30  ;;  %s172_s10 = scalar_lea.sflag [#allocation7], %s171_s28 }
  0x1d   : > { %p1292_p3 = pnand %p882_p1, %p229_p2  ;;  %s182_s7 = sshll.u32 %s180_s6, 4  ;;  %s183_s7 = int_to_ptr.hbm [resolvable:$true] %s182_s7 }
  0x1e   : > { %s215_s16 = scalar_lea.vmem [#allocation11], %s876_s29  ;;  %s1309_s22 = sand.u32 (!%p1292_p3), 1, %s1164_s13  }
  0x1f   : > { %s200_s8 = scalar_lea.hbm %s1461_s1, %s877_s30  ;;  %s224_s26 = sshll.u32 %s215_s16, 4  ;;  %s225_s26 = int_to_ptr.vmem [resolvable:$true] %s224_s26 }
  0x20   : > { %s202_s9 = sshll.u32 %s200_s8, 4  ;;  %s175_s8 = scalar_lea.vmem [#allocation6], %s876_s29  ;;  %s203_s9 = int_to_ptr.hbm [resolvable:$true] %s202_s9 }
  0x21   : > { %913 = dma.hbm_to_vmem [thread:$0]  (!%p1280_p0), %s203_s9, 128, %s205_s11, %s192_s19  }
  0x22   : > { %s184_s1 = sshll.u32 %s175_s8, 4  ;;  %s220_s11 = scalar_lea.hbm %s1448_s2, %s877_s30  ;;  %s185_s1 = int_to_ptr.vmem [resolvable:$true] %s184_s1 }
  0x23   : > { %910 = dma.hbm_to_vmem [thread:$0]  (!%p1280_p0), %s183_s7, 128, %s185_s1, %s172_s10  }
  0x24   : > { %s222_s20 = sshll.u32 %s220_s11, 4  ;;  %233 = sbr.rel (%p1292_p3) target bundleno = 1165 (0x48d), region = 32  ;;  %s223_s20 = int_to_ptr.hbm [resolvable:$true] %s222_s20 }
  0x25   : > { %916 = dma.hbm_to_vmem [thread:$0]  (!%p1280_p0), %s223_s20, 128, %s225_s26, %s192_s19  }
  0x26   : > { %s1312_s1 = sshll.u32 (!%p1292_p3), %s1309_s22, 3  ;;  %s236_s28 = scalar_lea.sflag (!%p1292_p3), [#allocation7], %s1309_s22 }
  0x27   : > { %s239_s30 = scalar_lea.vmem (!%p1292_p3), [#allocation6], %s1312_s1 }
  0x29   : > { %1147 = dma.done.wait (%p1259_p8), %s236_s28, 128  }
  0x2a   : > { %1149 = vsyncadd (%p1259_p8), %s236_s28, 4294967168  ;;  %s245_s16 = sand.u32 1, %s1239_s18   ;;  %s249_s26 = scalar_lea.vmem [#allocation9], %s1312_s1 }
  0x2b   : > { %s246_s20 = scalar_lea.sflag [#allocation10], %s245_s16 }
  0x2c   : > { %1151 = dma.done.wait (%p1259_p8), %s246_s20, 256  }
  0x2d   : > { %1153 = vsyncadd (%p1259_p8), %s246_s20, 4294967040  ;;  %vm311_vm0 = vcmask 261120   ;;  %v317_v0 = vld [vmem:[%s249_s26] sm:$0xff]  ;;  %v298_v1 = vld [vmem:[%s239_s30] sm:$0xff]  ;;  %vm302_vm1 = vcmask 7168   ;;  %v1182_v7 = vmov -inf  }
  0x2e   : > { %v318_v2 = vpack.c.bf16 %v317_v0, %v317_v0  ;;  %v299_v3 = vmul.f32 0.17677669, %v298_v1  ;;  %303 = vst.msk [vmem:[#allocation3] sm:$0xff] %vm302_vm1, %v1182_v7  ;;  %vm340_vm2 = vcmask 64512   ;;  %s1183_s18 = smov 64   ;;  %s1184_s24 = smov 32  }
  0x2f   : > { %304 = vst.msk [vmem:[#allocation3 + $0x8] sm:$0xff] %vm302_vm1, %v1182_v7  ;;  %s1185_s29 = smov 96   ;;  %v1186_v11 = vmov 0   ;;  %v1187_v12 = vmov 0.0   ;;  %s259_s4 = scalar_lea.vmem [#allocation11], %s1312_s1  ;;  %vm377_vm3 = vcmask 1043456  }
  0x30   : > { %v324_v4 = vsel %vm311_vm0, %v318_v2, 0  ;;  %v300_v5 = vpack.c.bf16 %v299_v3, %v299_v3  ;;  %305 = vst.msk [vmem:[#allocation3 + $0x10] sm:$0xff] %vm302_vm1, %v1182_v7  ;;  %497 = vrot.lane.b32.xlu2 %v318_v2, %s1183_s18  ;;  %977 = vset.pattern.permute.xlu1 %v1186_v11  ;;  %v364_v29 = vld [vmem:[%s259_s4] sm:$0xff]  ;;  %s896_s19 = sshll.u32 %s1172_s15, 3  ;;  %vm722_vm4 = vcmask 523264   ;;  %s292_s7 = scalar_lea.vmem [#allocation12], %s1312_s1 }
  0x31   : > { %333 = vmatpush.bf16.xpose.msra.mxu0 %v324_v4  ;;  %306 = vst.msk [vmem:[#allocation3 + $0x18] sm:$0xff] %vm302_vm1, %v1182_v7  ;;  %978 = vset.pattern.permute.xlu2 %v1186_v11  ;;  %v365_v30 = vpack.c.bf16 %v364_v29, %v364_v29  ;;  %s739_s6 = scalar_lea.hbm %s1449_s3, %s896_s19  ;;  %s741_s8 = sshll.u32 %s292_s7, 4  ;;  %vm724_vm5 = vcmask 785408   ;;  %s742_s8 = int_to_ptr.vmem [resolvable:$true] %s741_s8 }
  0x32   : > { %301 = vst [vmem:[#allocation2] sm:$0xf] %v300_v5  ;;  %979 = vset.pattern.permute.xlu0 %v1186_v11  ;;  %s743_s10 = sshll.u32 %s739_s6, 4  ;;  %s728_s15 = scalar_lea.sflag [#allocation8], %s1309_s22  ;;  %s744_s10 = int_to_ptr.hbm [resolvable:$true] %s743_s10 }
  0x33   : > { %307 = vst.msk [vmem:[#allocation4] sm:$0xff] %vm302_vm1, %v1187_v12  ;;  %v379_v32 = vsel %vm377_vm3, %v365_v30, 0  ;;  %s1108_s5 = sshra.s32 %s744_s10, 4  ;;  %s1114_s28 = scalar_lea.hbm %s1449_s3, 16  ;;  %s1109_s5 = int_to_ptr.hbm [resolvable:$true] %s1108_s5 }
  0x34   : > { %308 = vst.msk [vmem:[#allocation4 + $0x8] sm:$0xff] %vm302_vm1, %v1187_v12  ;;  %388 = vmatpush.bf16.msra.mxu1 %v379_v32  ;;  %s1110_s9 = scalar_lea.hbm %s1109_s5, 8  ;;  %p1115_p7 = scmp.lt.s32.totalorder %s1109_s5, %s1449_s3 }
  0x35   : > { %309 = vst.msk [vmem:[#allocation4 + $0x10] sm:$0xff] %vm302_vm1, %v1187_v12  ;;  %v1345_v16 = vld [vmem:[#allocation3] sm:$0xff]  ;;  %p1111_p4 = scmp.ne.s32.totalorder %s1109_s5, %s1110_s9  ;;  %p1116_p8 = scmp.lt.s32.totalorder %s1114_s28, %s1110_s9 }
  0x36   : > { %310 = vst.msk [vmem:[#allocation4 + $0x18] sm:$0xff] %vm302_vm1, %v1187_v12  ;;  %v428_v59 = vld [vmem:[#allocation3 + $0x8] sm:$0xff] }
  0x37   : > { %312 = vst.msk [vmem:[#allocation5] sm:$0xff] %vm311_vm0, %v1187_v12  ;;  %v519_v62 = vld [vmem:[#allocation3 + $0x10] sm:$0xff]  ;;  %p1112_p5 = pnand %p1111_p4, %p1263_p9  ;;  %p1117_p10 = por %p1116_p8, %p1115_p7 }
  0x38   : > { %588 = vrot.lane.b32.xlu2 %v318_v2, %s1184_s24  ;;  %313 = vst.msk [vmem:[#allocation5 + $0x8] sm:$0xff] %vm311_vm0, %v1187_v12  ;;  %v610_v55 = vld [vmem:[#allocation3 + $0x18] sm:$0xff] }
  0x39   : > { %v316_v6 = vld [vmem:[#allocation2] sm:$0xf]  ;;  %314 = vst.msk [vmem:[#allocation5 + $0x10] sm:$0xff] %vm311_vm0, %v1187_v12  ;;  %p1113_p6 = pneg %p1112_p5 }
  0x3a   : > { %887 = vmatmul.msk.bf16.vlgmr.msra.gmra.mxu0 %vm311_vm0, %v316_v6  ;;  %315 = vst.msk [vmem:[#allocation5 + $0x18] sm:$0xff] %vm311_vm0, %v1187_v12  ;;  %v579_v13 = vld [vmem:[#allocation2] sm:$0xf] }
  0x3b   : > { %v583_v14 = vunpack.c.l.b16 %v579_v13  ;;  %v397_v18 = vld [vmem:[#allocation2] sm:$0xf]  ;;  %p1118_p13 = pnand %p1117_p10, %p1113_p6 }
  0x3c   : > { %v401_v21 = vunpack.c.l.b16 %v397_v18  ;;  %v488_v23 = vld [vmem:[#allocation2] sm:$0xf] }
  0x3d   : > { %v584_v15 = vpack.c.b16 %v583_v14, %v583_v14  ;;  %v492_v24 = vunpack.c.l.b16 %v488_v23 }
  0x3e   : > { %v402_v22 = vpack.c.b16 %v401_v21, %v401_v21 }
  0x3f   : > { %v493_v25 = vpack.c.b16 %v492_v24, %v492_v24 }
  0x40   : > { %585 = vrot.lane.b32.xlu2 %v584_v15, %s1184_s24 }
  0x8a   : > { %v498_v28 = vpop.permute.xlu2 %497 }
  0x8b   : > { %v503_v31 = vsel %vm311_vm0, %v498_v28, 0 }
  0x8c   : > { %512 = vmatpush.bf16.xpose.msrb.mxu1 %v503_v31 }
  0x92   : > { %v589_v33 = vpop.permute.xlu2 %588 }
  0x93   : > { %v594_v34 = vsel %vm311_vm0, %v589_v33, 0 }
  0x94   : > { %603 = vmatpush.bf16.xpose.msrb.mxu0 %v594_v34 }
  0x9a   : > { %v586_v35 = vpop.permute.xlu2 %585 }
  0x9b   : > { %893 = vmatmul.msk.bf16.vlgmr.msrb.gmra.mxu0 %vm311_vm0, %v586_v35 }
  0xb7   : > { %v335_v8 = vpop.f32.mrf.mxu0 }
  0xb8   : > { %v341_v9 = vsel %vm340_vm2, %v335_v8, -inf }
  0xb9   : > { %342 = vmax.xlane.f32.xlu0 %v341_v9  ;;  %v356_v9 = vld [vmem:[#allocation4] sm:$0xff] }
  0xbf   : > { %v337_v10 = vpop.f32.mrf.mxu0 }
  0xcd   : > { %406 = vrot.lane.b32.xlu0 %v318_v2, %s1185_s29 }
 0x118   : > { %v605_v43 = vpop.f32.mrf.mxu0 }
 0x119   : > { %v611_v44 = vsel %vm340_vm2, %v605_v43, -inf }
 0x11a   : > { %612 = vmax.xlane.f32.xlu0 %v611_v44 }
 0x120   : > { %v607_v45 = vpop.f32.mrf.mxu0 }
 0x121   : > { %v445_v45 = vld [vmem:[#allocation4 + $0x8] sm:$0xff] }
 0x12c   : > { %v343_v17 = vpop.xlane.xlu0 %342 }
 0x12d   : > { %v1348_v19 = vmax.f32 %v1345_v16, %v343_v17 }
 0x12f   : > { %v345_v20 = vsub.f32 %v1345_v16, %v1348_v19  ;;  %396 = vst.msk [vmem:[#allocation3] sm:$0xff] %vm302_vm1, %v1348_v19  ;;  %350 = vperm.xlu1 %977, %v1348_v19  }
 0x131   : > { %v346_v0 = vmul.f32 1.442695, %v345_v20 }
 0x137   : > { %403 = vrot.lane.b32.xlu1 %v402_v22, %s1185_s29 }
 0x13f   : > { %494 = vrot.lane.b32.xlu1 %v493_v25, %s1183_s18  ;;  %v407_v26 = vpop.permute.xlu0 %406 }
 0x140   : > { %v412_v27 = vsel %vm311_vm0, %v407_v26, 0 }
 0x141   : > { %421 = vmatpush.bf16.xpose.msra.mxu2 %v412_v27 }
 0x18d   : > { %v613_v56 = vpop.xlane.xlu0 %612 }
 0x18e   : > { %v614_v57 = vmax.f32 %v610_v55, %v613_v56 }
 0x190   : > { %v615_v58 = vsub.f32 %v610_v55, %v614_v57  ;;  %669 = vst.msk [vmem:[#allocation3 + $0x18] sm:$0xff] %vm302_vm1, %v614_v57 }
 0x192   : > { %v616_v29 = vmul.f32 1.442695, %v615_v58 }
 0x1a1   : > { %v351_v36 = vpop.permute.xlu1 %350 }
 0x1a2   : > { %v353_v37 = vsub.f32 %v335_v8, %v351_v36 }
 0x1a4   : > { %v354_v38 = vmul.f32 1.442695, %v353_v37 }
 0x1a6   : > { %980 = vpow2.f32 %v354_v38 }
 0x1a7   : > { %982 = vpow2.f32 %v346_v0 }
 0x1a9   : > { %v404_v39 = vpop.permute.xlu1 %403 }
 0x1aa   : > { %889 = vmatmul.msk.bf16.vlgmr.msra.gmra.mxu2 %vm311_vm0, %v404_v39 }
 0x1ac   : > { %v981_v40 = vpop.eup %980 }
 0x1ad   : > { %v373_v41 = vpack.c.bf16 %v981_v40, %v981_v40  ;;  %v358_v54 = vsel %vm340_vm2, %v981_v40, 0.0  ;;  %v983_v5 = vpop.eup %982 }
 0x1ae   : > { %v357_v11 = vmul.f32 %v983_v5, %v356_v9 }
 0x1af   : > { %888 = vmatmul.msk.bf16.vlgmr.msra.gmra.mxu1 %vm340_vm2, %v373_v41 }
 0x1b1   : > { %v495_v42 = vpop.permute.xlu1 %494 }
 0x1bf   : > { %891 = vmatmul.msk.bf16.vlgmr.msrb.gmra.mxu1 %vm311_vm0, %v495_v42 }
 0x22c   : > { %v1367_v46 = vpop.f32.mrf.mxu1 }
 0x22d   : > { %v423_v47 = vpop.f32.mrf.mxu2 }
 0x22e   : > { %v429_v48 = vsel %vm340_vm2, %v423_v47, -inf }
 0x22f   : > { %430 = vmax.xlane.f32.xlu1 %v429_v48 }
 0x234   : > { %v392_v49 = vpop.f32.mrf.mxu1 }
 0x235   : > { %v425_v50 = vpop.f32.mrf.mxu2  ;;  %v627_v49 = vld [vmem:[#allocation4 + $0x18] sm:$0xff] }
 0x23c   : > { %v1370_v51 = vpop.f32.mrf.mxu1 }
 0x23d   : > { %v520_v52 = vsel %vm340_vm2, %v1370_v51, -inf }
 0x23e   : > { %521 = vmax.xlane.f32.xlu2 %v520_v52 }
 0x244   : > { %v516_v53 = vpop.f32.mrf.mxu1 }
 0x248   : > { %464 = vrot.lane.b32.xlu1 %v365_v30, %s1185_s29 }
 0x250   : > { %555 = vrot.lane.b32.xlu1 %v365_v30, %s1183_s18 }
 0x27a   : > { %359 = vadd.xlane.f32.xlu1 %v358_v54  ;;  %v455_v54 = vld [vmem:[#allocation5 + $0x8] sm:$0xff] }
 0x2a2   : > { %v431_v60 = vpop.xlane.xlu1 %430 }
 0x2a3   : > { %v432_v61 = vmax.f32 %v428_v59, %v431_v60 }
 0x2a5   : > { %487 = vst.msk [vmem:[#allocation3 + $0x8] sm:$0xff] %vm302_vm1, %v432_v61  ;;  %438 = vperm.xlu2 %978, %v432_v61   ;;  %v433_v3 = vsub.f32 %v428_v59, %v432_v61  ;;  %v637_v61 = vld [vmem:[#allocation5 + $0x18] sm:$0xff] }
 0x2a7   : > { %v434_v4 = vmul.f32 1.442695, %v433_v3 }
 0x2a9   : > { %984 = vpow2.f32 %v434_v4 }
 0x2ad   : > { %620 = vperm.xlu2 %978, %v614_v57  }
 0x2af   : > { %v985_v6 = vpop.eup %984 }
 0x2b1   : > { %v522_v63 = vpop.xlane.xlu2 %521 }
 0x2b2   : > { %v523_v1 = vmax.f32 %v519_v62, %v522_v63 }
 0x2b4   : > { %v524_v2 = vsub.f32 %v519_v62, %v523_v1  ;;  %578 = vst.msk [vmem:[#allocation3 + $0x10] sm:$0xff] %vm302_vm1, %v523_v1  ;;  %529 = vperm.xlu0 %979, %v523_v1  }
 0x2b5   : > { %646 = vrot.lane.b32.xlu2 %v365_v30, %s1184_s24  ;;  %v366_v30 = vld [vmem:[#allocation5] sm:$0xff] }
 0x2b6   : > { %v525_v35 = vmul.f32 1.442695, %v524_v2 }
 0x2ba   : > { %v465_v7 = vpop.permute.xlu1 %464 }
 0x2bb   : > { %v470_v10 = vsel %vm377_vm3, %v465_v7, 0 }
 0x2bc   : > { %479 = vmatpush.bf16.msra.mxu3 %v470_v10  ;;  %v546_v10 = vld [vmem:[#allocation5 + $0x10] sm:$0xff] }
 0x2bd   : > { %369 = vperm.xlu2 %978, %v983_v5   ;;  %v536_v5 = vld [vmem:[#allocation4 + $0x10] sm:$0xff] }
 0x2c2   : > { %v556_v8 = vpop.permute.xlu1 %555 }
 0x2c3   : > { %v561_v23 = vsel %vm377_vm3, %v556_v8, 0 }
 0x2c4   : > { %570 = vmatpush.bf16.msrb.mxu3 %v561_v23 }
 0x2c5   : > { %458 = vperm.xlu2 %978, %v985_v6  }
 0x2ed   : > { %v360_v12 = vpop.xlane.xlu1 %359 }
 0x2ee   : > { %v361_v13 = vadd.f32 %v360_v12, %v357_v11 }
 0x2f0   : > { %363 = vst.msk [vmem:[#allocation4] sm:$0xff] %vm302_vm1, %v361_v13 }
 0x2ff   : > { %v439_v14 = vpop.permute.xlu2 %438 }
 0x300   : > { %v441_v15 = vsub.f32 %v423_v47, %v439_v14 }
 0x302   : > { %v442_v16 = vmul.f32 1.442695, %v441_v15 }
 0x304   : > { %986 = vpow2.f32 %v442_v16 }
 0x307   : > { %v621_v17 = vpop.permute.xlu2 %620 }
 0x308   : > { %v623_v18 = vsub.f32 %v605_v43, %v621_v17  ;;  %v673_v43 = vld [vmem:[#allocation4] sm:$0xff] }
 0x30a   : > { %v987_v19 = vpop.eup %986  ;;  %v624_v20 = vmul.f32 1.442695, %v623_v18 }
 0x30b   : > { %v447_v21 = vsel %vm340_vm2, %v987_v19, 0.0  ;;  %v462_v22 = vpack.c.bf16 %v987_v19, %v987_v19 }
 0x30c   : > { %988 = vpow2.f32 %v624_v20  ;;  %448 = vadd.xlane.f32.xlu0 %v447_v21 }
 0x30d   : > { %890 = vmatmul.msk.bf16.vlgmr.msra.gmra.mxu3 %vm340_vm2, %v462_v22  ;;  %990 = vpow2.f32 %v616_v29 }
 0x30e   : > { %992 = vpow2.f32 %v525_v35 }
 0x30f   : > { %v647_v24 = vpop.permute.xlu2 %646 }
 0x310   : > { %v652_v25 = vsel %vm377_vm3, %v647_v24, 0 }
 0x311   : > { %661 = vmatpush.bf16.msrb.mxu2 %v652_v25 }
 0x312   : > { %v989_v26 = vpop.eup %988 }
 0x313   : > { %v629_v27 = vsel %vm340_vm2, %v989_v26, 0.0  ;;  %v644_v28 = vpack.c.bf16 %v989_v26, %v989_v26  ;;  %v991_v34 = vpop.eup %990 }
 0x314   : > { %630 = vadd.xlane.f32.xlu1 %v629_v27  ;;  %v993_v39 = vpop.eup %992  ;;  %v628_v50 = vmul.f32 %v991_v34, %v627_v49 }
 0x315   : > { %894 = vmatmul.msk.bf16.vlgmr.msrb.gmra.mxu2 %vm340_vm2, %v644_v28 }
 0x317   : > { %v370_v31 = vpop.permute.xlu2 %369 }
 0x318   : > { %v372_v32 = vmul.f32 %v370_v31, %v366_v30 }
 0x31a   : > { %v394_v33 = vadd.f32 %v1367_v46, %v372_v32  ;;  %v446_v46 = vmul.f32 %v985_v6, %v445_v45  ;;  %v537_v6 = vmul.f32 %v993_v39, %v536_v5 }
 0x31c   : > { %395 = vst.msk [vmem:[#allocation5] sm:$0xff] %vm311_vm0, %v394_v33 }
 0x31f   : > { %v459_v55 = vpop.permute.xlu2 %458 }
 0x320   : > { %640 = vperm.xlu0 %979, %v991_v34   ;;  %v461_v56 = vmul.f32 %v459_v55, %v455_v54 }
 0x323   : > { %v675_v27 = vld [vmem:[#allocation5] sm:$0xff] }
 0x326   : > { %v530_v36 = vpop.permute.xlu0 %529 }
 0x327   : > { %v532_v37 = vsub.f32 %v1370_v51, %v530_v36 }
 0x329   : > { %v533_v38 = vmul.f32 1.442695, %v532_v37 }
 0x32b   : > { %994 = vpow2.f32 %v533_v38 }
 0x32c   : > { %996 = vrcp.f32 %v673_v43 }
 0x32d   : > { %549 = vperm.xlu1 %977, %v993_v39  }
 0x331   : > { %v995_v40 = vpop.eup %994 }
 0x332   : > { %v538_v41 = vsel %vm340_vm2, %v995_v40, 0.0  ;;  %v553_v42 = vpack.c.bf16 %v995_v40, %v995_v40  ;;  %v997_v44 = vpop.eup %996 }
 0x333   : > { %539 = vadd.xlane.f32.xlu2 %v538_v41 }
 0x334   : > { %892 = vmatmul.msk.bf16.vlgmr.msrb.gmra.mxu3 %vm340_vm2, %v553_v42 }
 0x34b   : > { %678 = vperm.xlu2 %978, %v997_v44  }
 0x37f   : > { %v449_v47 = vpop.xlane.xlu0 %448 }
 0x380   : > { %v450_v48 = vadd.f32 %v449_v47, %v446_v46 }
 0x382   : > { %451 = vst.msk [vmem:[#allocation4 + $0x8] sm:$0xff] %vm302_vm1, %v450_v48 }
 0x387   : > { %v631_v51 = vpop.xlane.xlu1 %630 }
 0x388   : > { %v632_v52 = vadd.f32 %v631_v51, %v628_v50 }
 0x389   : > { %v682_v53 = vld [vmem:[#allocation4 + $0x8] sm:$0xff] }
 0x38a   : > { %633 = vst.msk [vmem:[#allocation4 + $0x18] sm:$0xff] %vm302_vm1, %v632_v52  ;;  %998 = vrcp.f32 %v682_v53 }
 0x390   : > { %v999_v57 = vpop.eup %998  ;;  %v481_v58 = vpop.f32.mrf.mxu3 }
 0x391   : > { %v485_v59 = vadd.f32 %v481_v58, %v461_v56  ;;  %687 = vperm.xlu0 %979, %v999_v57   ;;  %v700_v60 = vld [vmem:[#allocation4 + $0x18] sm:$0xff] }
 0x392   : > { %1000 = vrcp.f32 %v700_v60  ;;  %v641_v62 = vpop.permute.xlu0 %640 }
 0x393   : > { %486 = vst.msk [vmem:[#allocation5 + $0x8] sm:$0xff] %vm311_vm0, %v485_v59  ;;  %v643_v63 = vmul.f32 %v641_v62, %v637_v61 }
 0x398   : > { %v1001_v0 = vpop.eup %1000  ;;  %v483_v1 = vpop.f32.mrf.mxu3 }
 0x399   : > { %v663_v2 = vpop.f32.mrf.mxu2  ;;  %705 = vperm.xlu0 %979, %v1001_v0  }
 0x39a   : > { %v667_v3 = vadd.f32 %v663_v2, %v643_v63  ;;  %v684_v17 = vld [vmem:[#allocation5 + $0x8] sm:$0xff] }
 0x39c   : > { %668 = vst.msk [vmem:[#allocation5 + $0x18] sm:$0xff] %vm311_vm0, %v667_v3 }
 0x39f   : > { %v550_v11 = vpop.permute.xlu1 %549 }
 0x3a0   : > { %v552_v12 = vmul.f32 %v550_v11, %v546_v10 }
 0x3a1   : > { %v665_v4 = vpop.f32.mrf.mxu2 }
 0x3a3   : > { %v702_v20 = vld [vmem:[#allocation5 + $0x18] sm:$0xff] }
 0x3a6   : > { %v540_v7 = vpop.xlane.xlu2 %539 }
 0x3a7   : > { %v541_v8 = vadd.f32 %v540_v7, %v537_v6 }
 0x3a9   : > { %542 = vst.msk [vmem:[#allocation4 + $0x10] sm:$0xff] %vm302_vm1, %v541_v8 }
 0x3ae   : > { %v679_v26 = vpop.permute.xlu2 %678 }
 0x3af   : > { %v681_v29 = vmul.f32 %v679_v26, %v675_v27 }
 0x3b0   : > { %v691_v9 = vld [vmem:[#allocation4 + $0x10] sm:$0xff] }
 0x3b1   : > { %1002 = vrcp.f32 %v691_v9 }
 0x3b7   : > { %v1003_v13 = vpop.eup %1002  ;;  %v572_v14 = vpop.f32.mrf.mxu3 }
 0x3b8   : > { %v576_v15 = vadd.f32 %v572_v14, %v552_v12  ;;  %696 = vperm.xlu1 %977, %v1003_v13  }
 0x3ba   : > { %577 = vst.msk [vmem:[#allocation5 + $0x10] sm:$0xff] %vm311_vm0, %v576_v15 }
 0x3bf   : > { %v574_v16 = vpop.f32.mrf.mxu3 }
 0x3c1   : > { %v693_v23 = vld [vmem:[#allocation5 + $0x10] sm:$0xff] }
 0x403   : > { %v688_v18 = vpop.permute.xlu0 %687 }
 0x404   : > { %v690_v19 = vmul.f32 %v688_v18, %v684_v17 }
 0x406   : > { %710 = vrot.lane.b32.xlu1 %v690_v19, %s1184_s24 }
 0x40b   : > { %v706_v21 = vpop.permute.xlu0 %705 }
 0x40c   : > { %v708_v22 = vmul.f32 %v706_v21, %v702_v20 }
 0x40e   : > { %718 = vrot.lane.b32.xlu0 %v708_v22, %s1185_s29 }
 0x42a   : > { %v697_v24 = vpop.permute.xlu1 %696 }
 0x42b   : > { %v699_v25 = vmul.f32 %v697_v24, %v693_v23 }
 0x42d   : > { %714 = vrot.lane.b32.xlu2 %v699_v25, %s1183_s18 }
 0x478   : > { %v711_v28 = vpop.permute.xlu1 %710 }
 0x479   : > { %v721_v30 = vsel %vm311_vm0, %v681_v29, %v711_v28 }
 0x480   : > { %v719_v32 = vpop.permute.xlu0 %718 }
 0x487   : > { %v715_v31 = vpop.permute.xlu2 %714 }
 0x488   : > { %v723_v33 = vsel %vm722_vm4, %v721_v30, %v715_v31 }
 0x489   : > { %v725_v34 = vsel %vm724_vm5, %v723_v33, %v719_v32 }
 0x48a   : > { %726 = vst [vmem:[%s292_s7] sm:$0xff] %v725_v34 }
 0x48b   : > { %1121 = shalt.err (!%p1118_p13)
}
 0x48c   : > { %905 = dma.vmem_to_hbm [thread:$0]  (%p1263_p9), %s742_s8, 128, %s744_s10, %s728_s15  }
 0x48d PF: > { %s755_s22 = sand.u32 1, %s1160_s12   ;;  %p918_p0 = pnand %p875_p12, %p1270_p11 }
 0x48e   : > { %s756_s20 = scalar_lea.sflag [#allocation8], %s755_s22 }
 0x48f   : > { %p919_p1 = pneg %p918_p0 }
 0x491   : > { %1155 = dma.done.wait (%p919_p1), %s756_s20, 128  }
 0x492   : > { %1157 = vsyncadd (%p919_p1), %s756_s20, 4294967168  ;;  %s22_s17 = sadd.s32 1, %s1180_s17   ;;  %s1463_s26 = sld [smem:[#allocation18_spill]] }
 0x493   : > { %p19_p2 = scmp.ge.s32.totalorder %s22_s17, 4   ;;  %s1464_s15 = sld [smem:[#allocation16_spill]] }
 0x494   : > { %s1465_s16 = sld [smem:[#allocation17_spill]]  ;;  %s1466_s12 = smov %s1164_s13 }
 0x495   : > { %s1467_s13 = smov %s1168_s14  ;;  %21 = sbr.rel (!%p19_p2) target bundleno = 10 (0xa), region = 118 }
 0x498   : > { %s1468_s14 = smov %s1463_s26 }
 0x49a   :  { %762 = vsyncpa [#allocation7], 1 }
 0x49b   :  { %764 = vsyncpa [#allocation7 + $0x1], 1 }
 0x49c   :  { %765 = vsyncpa [#allocation10], 1 }
 0x49d   :  { %767 = vsyncpa [#allocation10 + $0x1], 1 }
 0x49e   :  { %768 = vsyncpa [#allocation8], 1 }
 0x49f   :  { %770 = vsyncpa [#allocation8 + $0x1], 1 }

</bundles_post_ra>
